<compile_context>
chip_gen: v7x
topology: tpu7x:2x2x1
jax: 0.10.0
libtpu: 0.0.40
codegen_flags: <defaults>
</compile_context>

<pallas_src>
import functools
import math

import jax
import jax.numpy as jnp
from jax.experimental import pallas as pl
from jax.experimental.pallas import tpu as pltpu

BN_EPS = 1e-5
VMEM_LIMIT_BYTES = 48 * 1024 * 1024   # < 64 MiB (v7x physical), ample headroom on v5e/v6e
CHUNK_COLS = 256                       # column chunk for the last (wide) layer of the pool stack


# ---------------------------------------------------------------------------
# Helpers
# ---------------------------------------------------------------------------
def _round_up(x, m):
    return ((x + m - 1) // m) * m


def _pick_tile(n):
    """Largest friendly point-tile that divides n (n is always a multiple of 8)."""
    for c in (1024, 512, 256, 128, 64, 32, 16, 8):
        if n % c == 0:
            return c
    return n


# ---------------------------------------------------------------------------
# Fused per-point MLP + global max-pool kernel
# ---------------------------------------------------------------------------
def _pointmlp_max_kernel(*refs, relus, chunk):
    """Fused per-point MLP (2-4 layers) + running max over the point axis.

    refs = (x_ref, w1_ref, s1_ref, ..., wL_ref, sL_ref, o_ref, acc_ref)
      x_ref  : (1, n_tile, Cin)   bf16
      w_ref  : (1, Cin, Cout)     bf16  (BN scale folded in; may be per-batch)
      s_ref  : (1, Cout)          f32   (BN shift + bias)
      o_ref  : (1, 1, Cout_last)  f32   output (written only on the last point tile)
      acc_ref: (1, Cout_last)     f32   VMEM scratch running-max accumulator
    """
    x_ref = refs[0]
    o_ref = refs[-2]
    acc_ref = refs[-1]
    n_layers = len(relus)
    t = pl.program_id(2)

    # Running max MUST init to -inf: the last layer may have no ReLU (Transform.conv3).
    @pl.when(t == 0)
    def _():
        acc_ref[...] = jnp.full(acc_ref.shape, -jnp.inf, acc_ref.dtype)

    h = x_ref[0]                                                     # (n_tile, Cin) bf16
    # All but the last layer: full-width matmul + shift (+ ReLU), fed back to the MXU in bf16.
    for l in range(n_layers - 1):
        w_ref, s_ref = refs[1 + 2 * l], refs[2 + 2 * l]
        h = jnp.dot(h, w_ref[0], preferred_element_type=jnp.float32) + s_ref[...]
        if relus[l]:
            h = jnp.maximum(h, 0.0)
        h = h.astype(jnp.bfloat16)

    # Last (wide) layer: chunk over output columns so the (n_tile, 1024) f32 intermediate is
    # never fully live; per chunk, shift (+ReLU), row-max, fold into the running max.
    w_ref, s_ref = refs[1 + 2 * (n_layers - 1)], refs[2 + 2 * (n_layers - 1)]
    c_out = w_ref.shape[-1]
    csz = chunk if (c_out > chunk and c_out % chunk == 0) else c_out
    w_last = w_ref[0]                                                # (Cin, Cout) bf16
    for c0 in range(0, c_out, csz):
        hc = jnp.dot(h, w_last[:, c0:c0 + csz],
                     preferred_element_type=jnp.float32)             # (n_tile, csz) f32
        hc = hc + s_ref[:, c0:c0 + csz]
        if relus[-1]:
            hc = jnp.maximum(hc, 0.0)
        tile_max = jnp.max(hc, axis=0, keepdims=True)                # (1, csz) f32
        acc_ref[:, c0:c0 + csz] = jnp.maximum(acc_ref[:, c0:c0 + csz], tile_max)

    @pl.when(t == pl.num_programs(2) - 1)
    def _():
        o_ref[0] = acc_ref[...]


def pointmlp_max(x, layers, relus, *, n_tile):
    """x: (B, Np, Cin) bf16; layers: list of (w (1|B, Cin, Cout) bf16, shift (1, Cout) f32).

    Returns (B, Cout_last) f32 = max over points of the fused per-point MLP.
    """
    B, Np, Cin = x.shape
    assert Np % n_tile == 0
    tiles = Np // n_tile
    # Split the point axis across a small 'parallel' axis so v7x's 2nd TensorCore is used at
    # small batch; each split keeps its own partial-max row, combined with one max() outside.
    n_split = 2 if (B <= 2 and tiles >= 2 and tiles % 2 == 0) else 1
    tps = tiles // n_split                                           # point tiles per split

    in_specs = [pl.BlockSpec((1, n_tile, Cin), lambda b, s, t: (b, s * tps + t, 0))]
    args = [x]
    for w, s in layers:
        if w.shape[0] == 1:     # weight shared across the batch
            in_specs.append(pl.BlockSpec(w.shape, lambda b, s, t: (0, 0, 0)))
        else:                   # per-batch fused weight (bmm folded into conv)
            in_specs.append(pl.BlockSpec((1,) + w.shape[1:], lambda b, s, t: (b, 0, 0)))
        in_specs.append(pl.BlockSpec(s.shape, lambda b, s, t: (0, 0)))
        args.extend([w, s])
    c_out = layers[-1][0].shape[-1]

    out = pl.pallas_call(
        functools.partial(_pointmlp_max_kernel, relus=tuple(relus), chunk=CHUNK_COLS),
        out_shape=jax.ShapeDtypeStruct((B, n_split, c_out), jnp.float32),
        grid_spec=pltpu.PrefetchScalarGridSpec(
            num_scalar_prefetch=0,
            grid=(B, n_split, tps),
            in_specs=in_specs,
            out_specs=pl.BlockSpec((1, 1, c_out), lambda b, s, t: (b, s, 0)),
            scratch_shapes=[pltpu.VMEM((1, c_out), jnp.float32)],
        ),
        compiler_params=pltpu.CompilerParams(
            dimension_semantics=("parallel", "parallel", "arbitrary"),
            vmem_limit_bytes=VMEM_LIMIT_BYTES,
        ),
    )(*args)
    return jnp.max(out, axis=1)                                      # (B, Cout_last) f32


# ---------------------------------------------------------------------------
# Fused 3-layer FC head kernel (bf16 weights, f32 accumulation)
# ---------------------------------------------------------------------------
def _fc_head_kernel(x_ref, w1_ref, s1_ref, w2_ref, s2_ref, w3_ref, s3_ref, o_ref, *,
                    logsoftmax):
    """Fused fc1(+BN,ReLU) -> fc2(+BN,ReLU) -> fc3 [+ log_softmax] on a tiny (B, C) tensor."""
    h = jnp.dot(x_ref[...], w1_ref[...], preferred_element_type=jnp.float32) + s1_ref[...]
    h = jnp.maximum(h, 0.0).astype(jnp.bfloat16)
    h = jnp.dot(h, w2_ref[...], preferred_element_type=jnp.float32) + s2_ref[...]
    h = jnp.maximum(h, 0.0).astype(jnp.bfloat16)
    h = jnp.dot(h, w3_ref[...], preferred_element_type=jnp.float32) + s3_ref[...]
    if logsoftmax:
        m = jnp.max(h, axis=1, keepdims=True)
        h = h - m
        h = h - jnp.log(jnp.sum(jnp.exp(h), axis=1, keepdims=True))
    o_ref[...] = h


def fc_head(x, fc1, fc2, fc3, *, logsoftmax):
    """x: (B, 1024) f32 -> (B, out_dim) f32; all three layers fused, weights/activations bf16."""
    B = x.shape[0]
    out_dim = fc3["wb"].shape[-1]
    args = (x.astype(jnp.bfloat16),
            fc1["wb"], fc1["shift"],
            fc2["wb"], fc2["shift"],
            fc3["wb"], fc3["shift"])
    in_specs = [pl.BlockSpec(a.shape, lambda i: (0, 0)) for a in args]
    return pl.pallas_call(
        functools.partial(_fc_head_kernel, logsoftmax=logsoftmax),
        out_shape=jax.ShapeDtypeStruct((B, out_dim), jnp.float32),
        grid_spec=pltpu.PrefetchScalarGridSpec(
            num_scalar_prefetch=0,
            grid=(1,),
            in_specs=in_specs,
            out_specs=pl.BlockSpec((B, out_dim), lambda i: (0, 0)),
        ),
        compiler_params=pltpu.CompilerParams(
            dimension_semantics=("arbitrary",),
            vmem_limit_bytes=VMEM_LIMIT_BYTES,
        ),
    )(*args)


# ---------------------------------------------------------------------------
# Deterministic parameter construction (synthetic, PyTorch-default-like init).
# BatchNorm is inference-mode; its scale is folded into the weight columns.
# ---------------------------------------------------------------------------
def _init_linear(key, cin, cout):
    k1, k2 = jax.random.split(key)
    bound = 1.0 / math.sqrt(cin)
    w = jax.random.uniform(k1, (cin, cout), jnp.float32, -bound, bound)
    b = jax.random.uniform(k2, (cout,), jnp.float32, -bound, bound)
    return w, b


def _init_bn(key, c):
    k1, k2, k3, k4 = jax.random.split(key, 4)
    gamma = jax.random.uniform(k1, (c,), jnp.float32, 0.8, 1.2)
    beta = jax.random.uniform(k2, (c,), jnp.float32, -0.1, 0.1)
    mean = jax.random.uniform(k3, (c,), jnp.float32, -0.1, 0.1)
    var = jax.random.uniform(k4, (c,), jnp.float32, 0.8, 1.2)
    return gamma, beta, mean, var


def make_conv_bn(key, cin, cout):
    """Conv1d(k=1) + BatchNorm1d folded: y = x @ (W*scale) + shift."""
    kl, kb = jax.random.split(key)
    w, b = _init_linear(kl, cin, cout)
    gamma, beta, mean, var = _init_bn(kb, cout)
    scale = gamma * jax.lax.rsqrt(var + BN_EPS)
    w_fold = w * scale[None, :]
    shift = ((b - mean) * scale + beta).reshape(1, cout)
    return {
        "w": w_fold,                                    # f32 (cin, cout) — for bmm folding
        "wb": w_fold.astype(jnp.bfloat16)[None],        # bf16 (1, cin, cout) — kernel weight
        "shift": shift,                                 # f32 (1, cout)
    }


def make_fc_bn(key, cin, cout):
    kl, kb = jax.random.split(key)
    w, b = _init_linear(kl, cin, cout)
    gamma, beta, mean, var = _init_bn(kb, cout)
    scale = gamma * jax.lax.rsqrt(var + BN_EPS)
    return {"wb": (w * scale[None, :]).astype(jnp.bfloat16),
            "shift": ((b - mean) * scale + beta).reshape(1, cout)}


def make_fc(key, cin, cout):
    w, b = _init_linear(key, cin, cout)
    return {"wb": w.astype(jnp.bfloat16), "shift": b.reshape(1, cout)}


def make_tnet_params(key, k):
    ks = jax.random.split(key, 6)
    return {
        "conv1": make_conv_bn(ks[0], k, 64),
        "conv2": make_conv_bn(ks[1], 64, 128),
        "conv3": make_conv_bn(ks[2], 128, 1024),
        "fc1": make_fc_bn(ks[3], 1024, 512),
        "fc2": make_fc_bn(ks[4], 512, 256),
        "fc3": make_fc(ks[5], 256, k * k),
    }


def make_pointnet_params(key, classes=10):
    ks = jax.random.split(key, 8)
    return {
        "transform": {
            "input_transform": make_tnet_params(ks[0], 3),
            "feature_transform": make_tnet_params(ks[1], 64),
            "conv1": make_conv_bn(ks[2], 3, 64),
            "conv2": make_conv_bn(ks[3], 64, 128),
            "conv3": make_conv_bn(ks[4], 128, 1024),
        },
        "fc1": make_fc_bn(ks[5], 1024, 512),
        "fc2": make_fc_bn(ks[6], 512, 256),
        "fc3": make_fc(ks[7], 256, classes),
    }


# ---------------------------------------------------------------------------
# Forward passes (thin glue around the fused Pallas kernels)
# ---------------------------------------------------------------------------
def tnet_forward(p, x, k, n_tile, pre_layers=(), pre_relus=()):
    """x: (B, Np, Cin) bf16 channels-last -> transform matrix (B, k, k) f32.

    `pre_layers`/`pre_relus` are extra per-point layers recomputed inside the fused conv stack
    (used to feed the feature T-Net without materializing h1 in HBM).
    """
    B = x.shape[0]
    layers = list(pre_layers) + [
        (p["conv1"]["wb"], p["conv1"]["shift"]),
        (p["conv2"]["wb"], p["conv2"]["shift"]),
        (p["conv3"]["wb"], p["conv3"]["shift"]),
    ]
    relus = tuple(pre_relus) + (True, True, True)
    pooled = pointmlp_max(x, layers, relus, n_tile=n_tile)           # (B, 1024) f32
    mat = fc_head(pooled, p["fc1"], p["fc2"], p["fc3"], logsoftmax=False)  # (B, k*k)
    return mat.reshape(B, k, k) + jnp.eye(k, dtype=mat.dtype)[None]


def pointnet_forward(params, inp, transform_flag=True):
    """inp: (B, 3, N) float32, NCW like the PyTorch Conv1d input."""
    B, _, N = inp.shape
    xb = jnp.transpose(inp, (0, 2, 1))                               # (B, N, 3) channels-last

    # Pad the point axis (replicating point 0 is harmless: every consumer of padded rows is a
    # global max-pool) so every kernel sees a tile-friendly N.
    target = 256 if N >= 256 else 8
    Np = _round_up(N, target)
    if Np != N:
        xb = jnp.concatenate(
            [xb, jnp.broadcast_to(xb[:, :1, :], (B, Np - N, 3))], axis=1)
    n_tile = _pick_tile(Np)
    xb16 = xb.astype(jnp.bfloat16)

    tp = params["transform"]
    if transform_flag:
        matrix3x3 = tnet_forward(tp["input_transform"], xb16, 3, n_tile)        # (B, 3, 3)
        # Fold bmm(x, M3) into conv1:  x @ M3 @ W1 == x @ (M3 @ W1)   (tiny per-batch matmul).
        w1b = jnp.einsum("bij,jk->bik", matrix3x3, tp["conv1"]["w"]).astype(jnp.bfloat16)
        pre = [(w1b, tp["conv1"]["shift"])]
        # Feature T-Net: recompute the folded 3->64 layer in-kernel (h1 never hits HBM).
        matrix64x64 = tnet_forward(tp["feature_transform"], xb16, 64, n_tile,
                                   pre_layers=pre, pre_relus=(True,))           # (B, 64, 64)
        # Fold bmm(h1, M64) into conv2; fuse conv1 -> conv2 -> conv3(BN, no ReLU) -> max-pool.
        w2b = jnp.einsum("bij,jk->bik", matrix64x64, tp["conv2"]["w"]).astype(jnp.bfloat16)
        pooled = pointmlp_max(
            xb16,
            layers=[(w1b, tp["conv1"]["shift"]),
                    (w2b, tp["conv2"]["shift"]),
                    (tp["conv3"]["wb"], tp["conv3"]["shift"])],
            relus=(True, True, False),
            n_tile=n_tile)                                                      # (B, 1024)
    else:
        # Whole conv stack + max-pool in a single fused kernel.
        pooled = pointmlp_max(
            xb16,
            layers=[(tp["conv1"]["wb"], tp["conv1"]["shift"]),
                    (tp["conv2"]["wb"], tp["conv2"]["shift"]),
                    (tp["conv3"]["wb"], tp["conv3"]["shift"])],
            relus=(True, True, False),
            n_tile=n_tile)
        # The reference hard-codes batch 32 for the dummy matrices; reproduced as-is.
        matrix3x3 = jnp.zeros((32, 3, 3), jnp.float32)
        matrix64x64 = jnp.zeros((32, 64, 64), jnp.float32)

    # TODO(synk): Dropout(p=0.4) is identity in eval/inference mode; not applied.
    logits = fc_head(pooled, params["fc1"], params["fc2"], params["fc3"],
                     logsoftmax=True)                                           # (B, classes)
    return logits, matrix3x3, matrix64x64


# ---------------------------------------------------------------------------
if __name__ == "__main__":
    key = jax.random.PRNGKey(0)
    pkey, xkey = jax.random.split(key)

    classes = 10
    B, N = 2, 16                                   # small shapes: batch=2, 16 points
    params = make_pointnet_params(pkey, classes=classes)
    inp = jax.random.normal(xkey, (B, 3, N), jnp.float32)

    out, m3, m64 = pointnet_forward(params, inp, transform_flag=True)
    jax.block_until_ready((out, m3, m64))

    assert out.shape == (B, classes)
    assert m3.shape == (B, 3, 3)
    assert m64.shape == (B, 64, 64)
    assert bool(jnp.isfinite(out).all())
    print("KERNEL_OK")
</pallas_src>

<mosaic_0001>
module attributes {stable_mosaic.version = 11 : i64} {
  func.func @_pointmlp_max_kernel(%arg0: i32, %arg1: i32, %arg2: i32, %arg3: memref<1x16x3xbf16, #tpu.memory_space<vmem>>, %arg4: memref<1x3x64xbf16, #tpu.memory_space<vmem>>, %arg5: memref<1x64xf32, #tpu.memory_space<vmem>>, %arg6: memref<1x64x128xbf16, #tpu.memory_space<vmem>>, %arg7: memref<1x128xf32, #tpu.memory_space<vmem>>, %arg8: memref<1x128x1024xbf16, #tpu.memory_space<vmem>>, %arg9: memref<1x1024xf32, #tpu.memory_space<vmem>>, %arg10: memref<1x1x1024xf32, #tpu.memory_space<vmem>>, %arg11: memref<1x1024xf32, #tpu.memory_space<vmem>>) attributes {dimension_semantics = [#tpu.dimension_semantics<parallel>, #tpu.dimension_semantics<parallel>, #tpu.dimension_semantics<arbitrary>], iteration_bounds = array<i64: 2, 1, 1>, scalar_prefetch = 0 : i64, scratch_operands = 1 : i64, tpu.core_type = #tpu.core_type<tc>, window_params = [{transform_indices = @transform_0, window_bounds = array<i64: 1, 16, 3>}, {pipeline_mode = #tpu.pipeline_mode<synchronous>, transform_indices = @transform_1, window_bounds = array<i64: 1, 3, 64>}, {pipeline_mode = #tpu.pipeline_mode<synchronous>, transform_indices = @transform_2, window_bounds = array<i64: 1, 64>}, {pipeline_mode = #tpu.pipeline_mode<synchronous>, transform_indices = @transform_3, window_bounds = array<i64: 1, 64, 128>}, {pipeline_mode = #tpu.pipeline_mode<synchronous>, transform_indices = @transform_4, window_bounds = array<i64: 1, 128>}, {pipeline_mode = #tpu.pipeline_mode<synchronous>, transform_indices = @transform_5, window_bounds = array<i64: 1, 128, 1024>}, {pipeline_mode = #tpu.pipeline_mode<synchronous>, transform_indices = @transform_6, window_bounds = array<i64: 1, 1024>}, {transform_indices = @transform_7, window_bounds = array<i64: 1, 1, 1024>}]} {
    %c0_i32 = arith.constant 0 : i32
    %0 = arith.cmpi eq, %arg2, %c0_i32 : i32
    %1 = arith.extui %0 : i1 to i32
    %c0_i32_0 = arith.constant 0 : i32
    %2 = arith.cmpi ne, %1, %c0_i32_0 : i32
    scf.if %2 {
      %cst_54 = arith.constant 0xFF800000 : f32
      %76 = vector.broadcast %cst_54 : f32 to vector<1x1024xf32>
      %c0_55 = arith.constant 0 : index
      %c0_56 = arith.constant 0 : index
      %77 = vector.load %arg11[%c0_55, %c0_56] : memref<1x1024xf32, #tpu.memory_space<vmem>>, vector<1x1024xf32>
      tpu.vector_store %arg11[%c0_55, %c0_56], %76 {strides = array<i32>} : memref<1x1024xf32, #tpu.memory_space<vmem>>, vector<1x1024xf32>,
    } else {
    }
    %c0 = arith.constant 0 : index
    %c0_1 = arith.constant 0 : index
    %c0_2 = arith.constant 0 : index
    %3 = vector.load %arg3[%c0, %c0_1, %c0_2] : memref<1x16x3xbf16, #tpu.memory_space<vmem>>, vector<1x16x3xbf16>
    %4 = vector.shape_cast %3 : vector<1x16x3xbf16> to vector<16x3xbf16>
    %c0_3 = arith.constant 0 : index
    %c0_4 = arith.constant 0 : index
    %c0_5 = arith.constant 0 : index
    %5 = vector.load %arg4[%c0_3, %c0_4, %c0_5] : memref<1x3x64xbf16, #tpu.memory_space<vmem>>, vector<1x3x64xbf16>
    %6 = vector.shape_cast %5 : vector<1x3x64xbf16> to vector<3x64xbf16>
    %cst = arith.constant dense<0.000000e+00> : vector<16x64xf32>
    %7 = tpu.matmul %4, %6, %cst {dimension_numbers = #tpu.dot_dimension_numbers<[1], [0], [0], [1], [0, 0, 1, 1], [], []>} : vector<16x3xbf16>, vector<3x64xbf16>, vector<16x64xf32> -> vector<16x64xf32>
    %c0_6 = arith.constant 0 : index
    %c0_7 = arith.constant 0 : index
    %8 = vector.load %arg5[%c0_6, %c0_7] : memref<1x64xf32, #tpu.memory_space<vmem>>, vector<1x64xf32>
    %9 = vector.broadcast %8 : vector<1x64xf32> to vector<16x64xf32>
    %10 = arith.addf %7, %9 : vector<16x64xf32>
    %cst_8 = arith.constant 0.000000e+00 : f32
    %11 = vector.broadcast %cst_8 : f32 to vector<16x64xf32>
    %12 = arith.maximumf %10, %11 : vector<16x64xf32>
    %13 = arith.truncf %12 : vector<16x64xf32> to vector<16x64xbf16>
    %c0_9 = arith.constant 0 : index
    %c0_10 = arith.constant 0 : index
    %c0_11 = arith.constant 0 : index
    %14 = vector.load %arg6[%c0_9, %c0_10, %c0_11] : memref<1x64x128xbf16, #tpu.memory_space<vmem>>, vector<1x64x128xbf16>
    %15 = vector.shape_cast %14 : vector<1x64x128xbf16> to vector<64x128xbf16>
    %cst_12 = arith.constant dense<0.000000e+00> : vector<16x128xf32>
    %16 = tpu.matmul %13, %15, %cst_12 {dimension_numbers = #tpu.dot_dimension_numbers<[1], [0], [0], [1], [0, 0, 1, 1], [], []>} : vector<16x64xbf16>, vector<64x128xbf16>, vector<16x128xf32> -> vector<16x128xf32>
    %c0_13 = arith.constant 0 : index
    %c0_14 = arith.constant 0 : index
    %17 = vector.load %arg7[%c0_13, %c0_14] : memref<1x128xf32, #tpu.memory_space<vmem>>, vector<1x128xf32>
    %18 = vector.broadcast %17 : vector<1x128xf32> to vector<16x128xf32>
    %19 = arith.addf %16, %18 : vector<16x128xf32>
    %cst_15 = arith.constant 0.000000e+00 : f32
    %20 = vector.broadcast %cst_15 : f32 to vector<16x128xf32>
    %21 = arith.maximumf %19, %20 : vector<16x128xf32>
    %22 = arith.truncf %21 : vector<16x128xf32> to vector<16x128xbf16>
    %c0_16 = arith.constant 0 : index
    %c0_17 = arith.constant 0 : index
    %c0_18 = arith.constant 0 : index
    %23 = vector.load %arg8[%c0_16, %c0_17, %c0_18] : memref<1x128x1024xbf16, #tpu.memory_space<vmem>>, vector<1x128x1024xbf16>
    %24 = vector.shape_cast %23 : vector<1x128x1024xbf16> to vector<128x1024xbf16>
    %25 = vector.extract_strided_slice %24 {offsets = [0, 0], sizes = [128, 256], strides = [1, 1]} : vector<128x1024xbf16> to vector<128x256xbf16>
    %cst_19 = arith.constant dense<0.000000e+00> : vector<16x256xf32>
    %26 = tpu.matmul %22, %25, %cst_19 {dimension_numbers = #tpu.dot_dimension_numbers<[1], [0], [0], [1], [0, 0, 1, 1], [], []>} : vector<16x128xbf16>, vector<128x256xbf16>, vector<16x256xf32> -> vector<16x256xf32>
    %c0_20 = arith.constant 0 : index
    %c0_21 = arith.constant 0 : index
    %27 = vector.load %arg9[%c0_20, %c0_21] : memref<1x1024xf32, #tpu.memory_space<vmem>>, vector<1x256xf32>
    %28 = vector.broadcast %27 : vector<1x256xf32> to vector<16x256xf32>
    %29 = arith.addf %26, %28 : vector<16x256xf32>
    %cst_22 = arith.constant 0.000000e+00 : f32
    %30 = vector.broadcast %cst_22 : f32 to vector<16x256xf32>
    %31 = arith.maximumf %29, %30 : vector<16x256xf32>
    %cst_23 = arith.constant dense<0xFF800000> : vector<256xf32>
    %32 = vector.multi_reduction <maximumf>, %31, %cst_23 [0] : vector<16x256xf32> to vector<256xf32>
    %33 = vector.shape_cast %32 : vector<256xf32> to vector<1x256xf32>
    %c0_24 = arith.constant 0 : index
    %c0_25 = arith.constant 0 : index
    %34 = vector.load %arg11[%c0_24, %c0_25] : memref<1x1024xf32, #tpu.memory_space<vmem>>, vector<1x256xf32>
    %35 = arith.maximumf %34, %33 : vector<1x256xf32>
    %c0_26 = arith.constant 0 : index
    %c0_27 = arith.constant 0 : index
    %36 = vector.load %arg11[%c0_26, %c0_27] : memref<1x1024xf32, #tpu.memory_space<vmem>>, vector<1x256xf32>
    tpu.vector_store %arg11[%c0_26, %c0_27], %35 {strides = array<i32>} : memref<1x1024xf32, #tpu.memory_space<vmem>>, vector<1x256xf32>,
    %37 = vector.extract_strided_slice %24 {offsets = [0, 256], sizes = [128, 256], strides = [1, 1]} : vector<128x1024xbf16> to vector<128x256xbf16>
    %cst_28 = arith.constant dense<0.000000e+00> : vector<16x256xf32>
    %38 = tpu.matmul %22, %37, %cst_28 {dimension_numbers = #tpu.dot_dimension_numbers<[1], [0], [0], [1], [0, 0, 1, 1], [], []>} : vector<16x128xbf16>, vector<128x256xbf16>, vector<16x256xf32> -> vector<16x256xf32>
    %c0_29 = arith.constant 0 : index
    %c256 = arith.constant 256 : index
    %39 = vector.load %arg9[%c0_29, %c256] : memref<1x1024xf32, #tpu.memory_space<vmem>>, vector<1x256xf32>
    %40 = vector.broadcast %39 : vector<1x256xf32> to vector<16x256xf32>
    %41 = arith.addf %38, %40 : vector<16x256xf32>
    %cst_30 = arith.constant 0.000000e+00 : f32
    %42 = vector.broadcast %cst_30 : f32 to vector<16x256xf32>
    %43 = arith.maximumf %41, %42 : vector<16x256xf32>
    %cst_31 = arith.constant dense<0xFF800000> : vector<256xf32>
    %44 = vector.multi_reduction <maximumf>, %43, %cst_31 [0] : vector<16x256xf32> to vector<256xf32>
    %45 = vector.shape_cast %44 : vector<256xf32> to vector<1x256xf32>
    %c0_32 = arith.constant 0 : index
    %c256_33 = arith.constant 256 : index
    %46 = vector.load %arg11[%c0_32, %c256_33] : memref<1x1024xf32, #tpu.memory_space<vmem>>, vector<1x256xf32>
    %47 = arith.maximumf %46, %45 : vector<1x256xf32>
    %c0_34 = arith.constant 0 : index
    %c256_35 = arith.constant 256 : index
    %48 = vector.load %arg11[%c0_34, %c256_35] : memref<1x1024xf32, #tpu.memory_space<vmem>>, vector<1x256xf32>
    tpu.vector_store %arg11[%c0_34, %c256_35], %47 {strides = array<i32>} : memref<1x1024xf32, #tpu.memory_space<vmem>>, vector<1x256xf32>,
    %49 = vector.extract_strided_slice %24 {offsets = [0, 512], sizes = [128, 256], strides = [1, 1]} : vector<128x1024xbf16> to vector<128x256xbf16>
    %cst_36 = arith.constant dense<0.000000e+00> : vector<16x256xf32>
    %50 = tpu.matmul %22, %49, %cst_36 {dimension_numbers = #tpu.dot_dimension_numbers<[1], [0], [0], [1], [0, 0, 1, 1], [], []>} : vector<16x128xbf16>, vector<128x256xbf16>, vector<16x256xf32> -> vector<16x256xf32>
    %c0_37 = arith.constant 0 : index
    %c512 = arith.constant 512 : index
    %51 = vector.load %arg9[%c0_37, %c512] : memref<1x1024xf32, #tpu.memory_space<vmem>>, vector<1x256xf32>
    %52 = vector.broadcast %51 : vector<1x256xf32> to vector<16x256xf32>
    %53 = arith.addf %50, %52 : vector<16x256xf32>
    %cst_38 = arith.constant 0.000000e+00 : f32
    %54 = vector.broadcast %cst_38 : f32 to vector<16x256xf32>
    %55 = arith.maximumf %53, %54 : vector<16x256xf32>
    %cst_39 = arith.constant dense<0xFF800000> : vector<256xf32>
    %56 = vector.multi_reduction <maximumf>, %55, %cst_39 [0] : vector<16x256xf32> to vector<256xf32>
    %57 = vector.shape_cast %56 : vector<256xf32> to vector<1x256xf32>
    %c0_40 = arith.constant 0 : index
    %c512_41 = arith.constant 512 : index
    %58 = vector.load %arg11[%c0_40, %c512_41] : memref<1x1024xf32, #tpu.memory_space<vmem>>, vector<1x256xf32>
    %59 = arith.maximumf %58, %57 : vector<1x256xf32>
    %c0_42 = arith.constant 0 : index
    %c512_43 = arith.constant 512 : index
    %60 = vector.load %arg11[%c0_42, %c512_43] : memref<1x1024xf32, #tpu.memory_space<vmem>>, vector<1x256xf32>
    tpu.vector_store %arg11[%c0_42, %c512_43], %59 {strides = array<i32>} : memref<1x1024xf32, #tpu.memory_space<vmem>>, vector<1x256xf32>,
    %61 = vector.extract_strided_slice %24 {offsets = [0, 768], sizes = [128, 256], strides = [1, 1]} : vector<128x1024xbf16> to vector<128x256xbf16>
    %cst_44 = arith.constant dense<0.000000e+00> : vector<16x256xf32>
    %62 = tpu.matmul %22, %61, %cst_44 {dimension_numbers = #tpu.dot_dimension_numbers<[1], [0], [0], [1], [0, 0, 1, 1], [], []>} : vector<16x128xbf16>, vector<128x256xbf16>, vector<16x256xf32> -> vector<16x256xf32>
    %c0_45 = arith.constant 0 : index
    %c768 = arith.constant 768 : index
    %63 = vector.load %arg9[%c0_45, %c768] : memref<1x1024xf32, #tpu.memory_space<vmem>>, vector<1x256xf32>
    %64 = vector.broadcast %63 : vector<1x256xf32> to vector<16x256xf32>
    %65 = arith.addf %62, %64 : vector<16x256xf32>
    %cst_46 = arith.constant 0.000000e+00 : f32
    %66 = vector.broadcast %cst_46 : f32 to vector<16x256xf32>
    %67 = arith.maximumf %65, %66 : vector<16x256xf32>
    %cst_47 = arith.constant dense<0xFF800000> : vector<256xf32>
    %68 = vector.multi_reduction <maximumf>, %67, %cst_47 [0] : vector<16x256xf32> to vector<256xf32>
    %69 = vector.shape_cast %68 : vector<256xf32> to vector<1x256xf32>
    %c0_48 = arith.constant 0 : index
    %c768_49 = arith.constant 768 : index
    %70 = vector.load %arg11[%c0_48, %c768_49] : memref<1x1024xf32, #tpu.memory_space<vmem>>, vector<1x256xf32>
    %71 = arith.maximumf %70, %69 : vector<1x256xf32>
    %c0_50 = arith.constant 0 : index
    %c768_51 = arith.constant 768 : index
    %72 = vector.load %arg11[%c0_50, %c768_51] : memref<1x1024xf32, #tpu.memory_space<vmem>>, vector<1x256xf32>
    tpu.vector_store %arg11[%c0_50, %c768_51], %71 {strides = array<i32>} : memref<1x1024xf32, #tpu.memory_space<vmem>>, vector<1x256xf32>,
    %c0_i32_52 = arith.constant 0 : i32
    %73 = arith.cmpi eq, %arg2, %c0_i32_52 : i32
    %74 = arith.extui %73 : i1 to i32
    %c0_i32_53 = arith.constant 0 : i32
    %75 = arith.cmpi ne, %74, %c0_i32_53 : i32
    scf.if %75 {
      %c0_54 = arith.constant 0 : index
      %c0_55 = arith.constant 0 : index
      %76 = vector.load %arg11[%c0_54, %c0_55] : memref<1x1024xf32, #tpu.memory_space<vmem>>, vector<1x1024xf32>
      %c0_56 = arith.constant 0 : index
      %c0_57 = arith.constant 0 : index
      %c0_58 = arith.constant 0 : index
      %77 = vector.load %arg10[%c0_56, %c0_57, %c0_58] : memref<1x1x1024xf32, #tpu.memory_space<vmem>>, vector<1x1x1024xf32>
      %78 = vector.shape_cast %77 : vector<1x1x1024xf32> to vector<1x1024xf32>
      %79 = vector.shape_cast %76 : vector<1x1024xf32> to vector<1x1x1024xf32>
      tpu.vector_store %arg10[%c0_56, %c0_57, %c0_58], %79 {strides = array<i32>} : memref<1x1x1024xf32, #tpu.memory_space<vmem>>, vector<1x1x1024xf32>,
    } else {
    }
    return
  }
  func.func @transform_0(%arg0: i32, %arg1: i32, %arg2: i32) -> (i32, i32, i32) {
    %c1_i32 = arith.constant 1 : i32
    %0 = arith.muli %arg1, %c1_i32 : i32
    %1 = arith.addi %0, %arg2 : i32
    %c0_i32 = arith.constant 0 : i32
    %c0_i32_0 = arith.constant 0 : i32
    return %arg0, %1, %c0_i32 : i32, i32, i32
  }
  func.func @transform_1(%arg0: i32, %arg1: i32, %arg2: i32) -> (i32, i32, i32) {
    %c0_i32 = arith.constant 0 : i32
    %c0_i32_0 = arith.constant 0 : i32
    %c0_i32_1 = arith.constant 0 : i32
    %c0_i32_2 = arith.constant 0 : i32
    return %c0_i32, %c0_i32_0, %c0_i32_1 : i32, i32, i32
  }
  func.func @transform_2(%arg0: i32, %arg1: i32, %arg2: i32) -> (i32, i32) {
    %c0_i32 = arith.constant 0 : i32
    %c0_i32_0 = arith.constant 0 : i32
    %c0_i32_1 = arith.constant 0 : i32
    return %c0_i32, %c0_i32_0 : i32, i32
  }
  func.func @transform_3(%arg0: i32, %arg1: i32, %arg2: i32) -> (i32, i32, i32) {
    %c0_i32 = arith.constant 0 : i32
    %c0_i32_0 = arith.constant 0 : i32
    %c0_i32_1 = arith.constant 0 : i32
    %c0_i32_2 = arith.constant 0 : i32
    return %c0_i32, %c0_i32_0, %c0_i32_1 : i32, i32, i32
  }
  func.func @transform_4(%arg0: i32, %arg1: i32, %arg2: i32) -> (i32, i32) {
    %c0_i32 = arith.constant 0 : i32
    %c0_i32_0 = arith.constant 0 : i32
    %c0_i32_1 = arith.constant 0 : i32
    return %c0_i32, %c0_i32_0 : i32, i32
  }
  func.func @transform_5(%arg0: i32, %arg1: i32, %arg2: i32) -> (i32, i32, i32) {
    %c0_i32 = arith.constant 0 : i32
    %c0_i32_0 = arith.constant 0 : i32
    %c0_i32_1 = arith.constant 0 : i32
    %c0_i32_2 = arith.constant 0 : i32
    return %c0_i32, %c0_i32_0, %c0_i32_1 : i32, i32, i32
  }
  func.func @transform_6(%arg0: i32, %arg1: i32, %arg2: i32) -> (i32, i32) {
    %c0_i32 = arith.constant 0 : i32
    %c0_i32_0 = arith.constant 0 : i32
    %c0_i32_1 = arith.constant 0 : i32
    return %c0_i32, %c0_i32_0 : i32, i32
  }
  func.func @transform_7(%arg0: i32, %arg1: i32, %arg2: i32) -> (i32, i32, i32) {
    %c0_i32 = arith.constant 0 : i32
    %c0_i32_0 = arith.constant 0 : i32
    return %arg0, %arg1, %c0_i32 : i32, i32, i32
  }
}

</mosaic_0001>

<bundles_post_ra>
// kernel: tpu_custom_call.1
= control target key start
LH: loop header
LB: loop body
LE: loop exit
PB: predicated region body
PF: predicated region fallthrough
CT: control target
= control target key end

     0   :  { %12 = vsyncpa [#allocation4], 0  ;;  %s2056_s0 = inlined_call_operand.vmem [shape: bf16[2,16,3], index: 0, kind: input, shape index: {}]   ;;  %s2057_s1 = inlined_call_operand.vmem [shape: bf16[1,3,64], index: 1, kind: input, shape index: {}]   ;;  %s2058_s2 = inlined_call_operand.vmem [shape: f32[1,64], index: 2, kind: input, shape index: {}]   ;;  %s2059_s3 = inlined_call_operand.hbm [shape: bf16[1,64,128], index: 3, kind: input, shape index: {}]   ;;  %s2060_s4 = inlined_call_operand.vmem [shape: f32[1,128], index: 4, kind: input, shape index: {}]   ;;  %s2061_s5 = inlined_call_operand.hbm [shape: bf16[1,128,1024], index: 5, kind: input, shape index: {}]   ;;  %s2062_s6 = inlined_call_operand.vmem [shape: f32[1,1024], index: 6, kind: input, shape index: {}]   ;;  %s2063_s7 = inlined_call_operand.hbm [shape: f32[2,1,1024], index: 7, kind: output, shape index: {}]  }
   0x1   :  { %13 = vsyncpa [#allocation7], 0 }
   0x2   :  { %14 = vsyncpa [#allocation5], 0 }
   0x3   :  { %16 = vsyncpa [#allocation5 + $0x1], 0  ;;  %s1806_s24 = smov 0   ;;  %s1808_s25 = smov 0  }
   0x4   :  { %s1810_s26 = smov 0   ;;  %s1812_s27 = smov 0  }
   0x5   :  { %s1814_s28 = smov 0   ;;  %s1816_s29 = smov 0  }
   0x6 LB: > { %2070 = sst [smem:[#allocation12_spill]] %s1747_s28  ;;  %s1401_s30 = sadd.s32 4294967295, %s1751_s29   ;;  %s1751_s29 = sphi %s1816_s29, %s22_s29   ;;  %s1747_s28 = sphi %s1814_s28, %s2086_s28   ;;  %s1743_s27 = sphi %s1812_s27, %s2085_s27   ;;  %s1739_s26 = sphi %s1810_s26, %s2089_s26   ;;  %s1735_s25 = sphi %s1808_s25, %s2088_s25   ;;  %s1731_s24 = sphi %s1806_s24, %s2087_s24  }
   0x7   : > { %s1402_s8 = sadd.s32 4294967294, %s1751_s29   ;;  %s41_s9 = sadd.s32 1, %s1747_s28 }
   0x8   : > { %s206_s10 = sadd.s32 1, %s1739_s26  ;;  %p43_p0 = scmp.ge.s32.totalorder %s41_s9, 2 }
   0x9   : > { %p216_p1 = scmp.ne.s32.totalorder %s1739_s26, %s1735_s25  ;;  %p217_p2 = scmp.eq.s32.totalorder %s1401_s30, 1 }
   0xa   : > { %p222_p3 = scmp.ne.s32.totalorder %s1735_s25, %s1731_s24  ;;  %s2091_s9 = smov (%p43_p0, %s41_s9), 0 }
   0xb   : > { %2071 = sst [smem:[#allocation13_spill]] %s2091_s9  ;;  %p1846_p4 = por %p217_p2, %p216_p1 }
   0xc   : > { %p223_p5 = scmp.eq.s32.totalorder %s1402_s8, 1  ;;  %s201_s12 = ssub.s32 %s1747_s28, %s2091_s9 }
   0xd   : > { %s2072_s11 = scalar_select %p1846_p4, 1, 0 }
   0xe   : > { %p1403_p6 = scmp.ge.s32.totalorder %s1751_s29, 1  ;;  %p204_p7 = scmp.eq.s32.totalorder %s201_s12, 0 }
   0xf   : > { %p1853_p8 = por %p223_p5, %p222_p3  ;;  %p230_p9 = scmp.lt.s32.totalorder %s1751_s29, 3 }
  0x10   : > { %s1859_s14 = scalar_select %p204_p7, %s1739_s26, %s206_s10  }
  0x11   : > { %s2073_s13 = scalar_select %p1853_p8, 1, 0 }
  0x12   : > { %2074 = sst [smem:[#allocation14_spill]] %s1859_s14  ;;  %p1861_p10 = pnand %p1403_p6, %p230_p9 }
  0x13   : > { %p1865_p11 = scmp.eq.s32.totalorder %s1401_s30, 0  ;;  %s1753_s17 = smov [#allocation3]  }
  0x14   : > { %s2075_s15 = scalar_select %p1861_p10, 1, 0 }
  0x15   : > { %s2076_s16 = scalar_select %p1865_p11, 1, 0 }
  0x16   : > { %p1528_p12 = pneg %p1861_p10  ;;  %s248_s18 = sshll.u32 %s1753_s17, 4  ;;  %s249_s18 = int_to_ptr.vmem [resolvable:$true] %s248_s18 }
  0x17   : > { %s1754_s20 = smov [#allocation6]   ;;  %s1609_s30 = scalar_lea.hbm %s2059_s3, 512 }
  0x18   : > { %p1873_p13 = pnand %p1865_p11, %p1528_p12  ;;  %s264_s21 = sshll.u32 %s1754_s20, 4  ;;  %s1877_s21 = int_to_ptr.vmem [resolvable:$true] %s264_s21 }
  0x19   : > { %p1610_p0 = scmp.ne.s32.totalorder %s2059_s3, %s1609_s30  ;;  %p1616_p5 = scmp.lt.u32.totalorder %s1609_s30, %s2059_s3 }
  0x1a   : > { %p1611_p1 = pneg %p1873_p13 }
  0x1c   : > { %p1612_p2 = pnand %p1611_p1, %p1610_p0 }
  0x1e   : > { %p1613_p3 = pneg %p1612_p2 }
  0x20   : > { %p1618_p6 = pnand %p1616_p5, %p1613_p3 }
  0x22   : > { %1621 = shalt.err (!%p1618_p6)
}
  0x23   : > { %s1622_s20 = scalar_lea.vmem %s249_s18, 512  ;;  %p1630_p8 = scmp.lt.s32.totalorder %s249_s18, %s249_s18 }
  0x24   : > { %p1623_p7 = scmp.ne.s32.totalorder %s249_s18, %s1622_s20  ;;  %p1631_p4 = scmp.lt.s32.totalorder %s1622_s20, %s1622_s20 }
  0x26   : > { %p1625_p9 = pnand %p1623_p7, %p1611_p1  ;;  %p1632_p11 = por %p1631_p4, %p1630_p8 }
  0x28   : > { %p1626_p12 = pneg %p1625_p9 }
  0x2a   : > { %p1633_p10 = pnand %p1632_p11, %p1626_p12 }
  0x2c   : > { %1636 = shalt.err (!%p1633_p10)
}
  0x2d   : > { %s1755_s22 = smov 64   ;;  %s1756_s23 = smov 4  }
  0x2e   : > { %1531 = dma.hbm_to_vmem [thread:$0]  (!%p1873_p13), %s2059_s3, 512, %s249_s18, [#allocation4], %s1755_s22, %s1755_s22, %s1756_s23  }
  0x2f   : > { %s1637_s17 = scalar_lea.hbm %s2061_s5, 8192 }
  0x30   : > { %p1638_p0 = scmp.ne.s32.totalorder %s2061_s5, %s1637_s17  ;;  %p1644_p10 = scmp.lt.u32.totalorder %s1637_s17, %s2061_s5 }
  0x32   : > { %p1640_p4 = pnand %p1638_p0, %p1611_p1 }
  0x34   : > { %p1641_p8 = pneg %p1640_p4 }
  0x36   : > { %p1646_p11 = pnand %p1644_p10, %p1641_p8 }
  0x38   : > { %1649 = shalt.err (!%p1646_p11)
}
  0x39   : > { %s1650_s18 = scalar_lea.vmem %s1877_s21, 8192  ;;  %p1658_p6 = scmp.lt.s32.totalorder %s1877_s21, %s1877_s21 }
  0x3a   : > { %p1651_p2 = scmp.ne.s32.totalorder %s1877_s21, %s1650_s18  ;;  %p1659_p7 = scmp.lt.s32.totalorder %s1650_s18, %s1650_s18 }
  0x3c   : > { %p1653_p3 = pnand %p1651_p2, %p1611_p1  ;;  %p1660_p9 = por %p1659_p7, %p1658_p6 }
  0x3e   : > { %p1654_p5 = pneg %p1653_p3 }
  0x40   : > { %p1661_p12 = pnand %p1660_p9, %p1654_p5 }
  0x42   : > { %1664 = shalt.err (!%p1661_p12)
}
  0x43   : > { %s1757_s28 = smov 512   ;;  %s1758_s9 = smov 32  }
  0x44   : > { %1534 = dma.hbm_to_vmem [thread:$0]  (!%p1873_p13), %s2061_s5, 8192, %s1877_s21, [#allocation7], %s1757_s28, %s1757_s28, %s1758_s9  }
  0x45   : > { %p2078_p0 = scmp.ne.s32.totalorder %s2075_s15, 0 }
  0x46   : > { %p2079_p1 = scmp.ne.s32.totalorder (!%p2078_p0), %s2076_s16, 0 }
  0x47   : > { %298 = sbr.rel (%p2078_p0) target bundleno = 825 (0x339), region = 48 }
  0x4e   : > { %1718 = dma.done.wait (%p2079_p1), [#allocation4], 512  }
  0x4f   : > { %1720 = vsyncadd (%p2079_p1), [#allocation4], 4294966784 }
  0x50   : > { %1722 = dma.done.wait (%p2079_p1), [#allocation7], 8192  }
  0x51   : > { %1724 = vsyncadd (%p2079_p1), [#allocation7], 4294959104  ;;  %vm376_vm0 = vcmask 1040384   ;;  %v1759_v0 = vmov 0.0   ;;  %p341_p13 = scmp.lt.s32.totalorder %s1743_s27, 1  ;;  %vm377_vm1 = vcmask 1041408  }
  0x52   : > { %1500 = vmatprep.subr.bf16.mxu0 %v1759_v0  ;;  %1506 = vmatprep.subr.bf16.mxu1 %v1759_v0  ;;  %v1760_v1 = vmov 65535   ;;  %vm1761_vm2 = vmmov 0   ;;  %v359_v4 = vld [vmem:[%s2057_s1] sm:$0x3]  ;;  %v1605_v7 = vld [vmem:[#allocation3] sm:$0xff]   ;;  %vm372_vm3 = vcmask 23552  }
  0x53   : > { %v378_v2 = vsel %vm376_vm0, 4294967295, %v1760_v1  ;;  %1502 = vmatprep.mubr.msk.bf16.mxu0 %vm1761_vm2, %v1759_v0  ;;  %1514 = vmatprep.mubr.msk.bf16.mxu1 %vm1761_vm2, %v1759_v0  ;;  %s342_s15 = scalar_select %p341_p13, %s1743_s27, 1  ;;  %v1606_v8 = vld [vmem:[#allocation3 + $0x8] sm:$0xff]   ;;  %v1607_v9 = vld [vmem:[#allocation3 + $0x10] sm:$0xff]   ;;  %v1608_v10 = vld [vmem:[#allocation3 + $0x18] sm:$0xff]   ;;  %vm466_vm4 = vcmask 523264  }
  0x54   : > { %v379_v3 = vsel %vm377_vm1, %v378_v2, 0  ;;  %1507 = vmatpush3.bf16.msra.mxu1 %v1605_v7  ;;  %v514_v11 = vld [vmem:[#allocation6] sm:$0xff]  ;;  %v515_v13 = vld [vmem:[#allocation6 + $0x8] sm:$0xff]  ;;  %v1413_v39 = vld [vmem:[%s2058_s2] ss:$0 sm:$0xff]  ;;  %s336_s23 = sand.u32 1, %s1735_s25  }
  0x55   : > { %s1491_s19 = sshll.u32 %s342_s15, 3  ;;  %v381_v5 = vand.u32 %v379_v3, %v359_v4  ;;  %1508 = vmatprep.subr.bf16.mxu1 %v1759_v0  ;;  %v518_v12 = vld [vmem:[#allocation6 + $0x20] sm:$0xff]  ;;  %v519_v16 = vld [vmem:[#allocation6 + $0x28] sm:$0xff]  ;;  %s1492_s30 = sshll.u32 %s1743_s27, 7 }
  0x56   : > { %s348_s16 = scalar_lea.vmem %s2056_s0, %s1491_s19  ;;  %v1422_v14 = vcombine.low %v514_v11, %v518_v12  ;;  %v1423_v15 = vcombine.high %v514_v11, %v518_v12  ;;  %v522_v17 = vld [vmem:[#allocation6 + $0x40] sm:$0xff]  ;;  %v1438_v19 = vcombine.low %v515_v13, %v519_v16  ;;  %v1439_v20 = vcombine.high %v515_v13, %v519_v16  ;;  %v523_v46 = vld [vmem:[#allocation6 + $0x48] sm:$0xff]  ;;  %s2009_s20 = scalar_lea.hbm %s2063_s7, %s1492_s30 }
  0x57   : > { %v1604_v6 = vld [vmem:[%s348_s16] sm:$0xff]   ;;  %1501 = vmatpush3.bf16.msra.mxu0 %v381_v5  ;;  %v526_v18 = vld [vmem:[#allocation6 + $0x60] sm:$0xff]  ;;  %v527_v47 = vld [vmem:[#allocation6 + $0x68] sm:$0xff]  ;;  %s1410_s16 = sshll.u32 %s336_s23, 3  ;;  %s1284_s18 = scalar_lea.sflag [#allocation5], %s336_s23 }
  0x58   : > { %1509 = vmatpush3.bf16.msra.mxu1 %v1606_v8  ;;  %v1425_v21 = vcombine.high %v522_v17, %v526_v18  ;;  %670 = vmatprep.subr.bf16.mxu0 %v1423_v15  ;;  %v1424_v22 = vcombine.low %v522_v17, %v526_v18  ;;  %v530_v23 = vld [vmem:[#allocation6 + $0x80] sm:$0xff]  ;;  %v1441_v51 = vcombine.high %v523_v46, %v527_v47  ;;  %v531_v52 = vld [vmem:[#allocation6 + $0x88] sm:$0xff]  ;;  %s338_s8 = scalar_lea.vmem [#allocation8], %s1410_s16  ;;  %p2082_p8 = scmp.ne.s32.totalorder %s2072_s11, 0 }
  0x59   : > { %1510 = vmatprep.subr.bf16.mxu1 %v1759_v0  ;;  %v534_v24 = vld [vmem:[#allocation6 + $0xa0] sm:$0xff]  ;;  %v535_v53 = vld [vmem:[#allocation6 + $0xa8] sm:$0xff]  ;;  %v1440_v54 = vcombine.low %v523_v46, %v527_v47  ;;  %v532_v46 = vld [vmem:[#allocation6 + $0x90] sm:$0xff]  ;;  %s1300_s10 = sshll.u32 %s338_s8, 4  ;;  %s1765_s27 = smov [#allocation8]   ;;  %s2011_s10 = int_to_ptr.vmem [resolvable:$true] %s1300_s10 }
  0x5a   : > { %1503 = vmatmul.mubr.msk.bf16.vlgmr.msra.gmra.mrb[0].mxu0 %vm372_vm3, %v1604_v6  ;;  %v1427_v25 = vcombine.high %v530_v23, %v534_v24  ;;  %v1426_v26 = vcombine.low %v530_v23, %v534_v24  ;;  %v538_v27 = vld [vmem:[#allocation6 + $0xc0] sm:$0xff]  ;;  %v1443_v55 = vcombine.high %v531_v52, %v535_v53  ;;  %v539_v56 = vld [vmem:[#allocation6 + $0xc8] sm:$0xff]  ;;  %v1442_v58 = vcombine.low %v531_v52, %v535_v53  ;;  %v517_v23 = vld [vmem:[#allocation6 + $0x18] sm:$0xff]  ;;  %s1665_s28 = scalar_lea.vmem %s2011_s10, 128  ;;  %s1669_s9 = sshll.u32 %s1765_s27, 4  ;;  %s1670_s9 = int_to_ptr.vmem [resolvable:$false] %s1669_s9 }
  0x5b   : > { %671 = vmatpush1.bf16.msra.mxu0 %v1422_v14  ;;  %v542_v28 = vld [vmem:[#allocation6 + $0xe0] sm:$0xff]  ;;  %v543_v57 = vld [vmem:[#allocation6 + $0xe8] sm:$0xff]  ;;  %v536_v47 = vld [vmem:[#allocation6 + $0xb0] sm:$0xff]  ;;  %p1666_p4 = scmp.ne.s32.totalorder %s2011_s10, %s1665_s28  ;;  %s1671_s14 = scalar_lea.vmem %s1670_s9, 256 }
  0x5c   : > { %1511 = vmatpush3.bf16.msra.mxu1 %v1607_v9  ;;  %672 = vmatprep.subr.bf16.mxu0 %v1425_v21  ;;  %v1429_v29 = vcombine.high %v538_v27, %v542_v28  ;;  %v1428_v30 = vcombine.low %v538_v27, %v542_v28  ;;  %v546_v31 = vld [vmem:[#allocation6 + $0x100] sm:$0xff]  ;;  %v1445_v59 = vcombine.high %v539_v56, %v543_v57  ;;  %v547_v60 = vld [vmem:[#allocation6 + $0x108] sm:$0xff]  ;;  %v516_v21 = vld [vmem:[#allocation6 + $0x10] sm:$0xff]  ;;  %p1672_p2 = scmp.lt.s32.totalorder %s2011_s10, %s1670_s9  ;;  %p1673_p3 = scmp.lt.s32.totalorder %s1671_s14, %s1665_s28 }
  0x5d   : > { %1512 = vmatprep.subr.bf16.mxu1 %v1759_v0  ;;  %v550_v32 = vld [vmem:[#allocation6 + $0x120] sm:$0xff]  ;;  %v551_v61 = vld [vmem:[#allocation6 + $0x128] sm:$0xff]  ;;  %v1444_v62 = vcombine.low %v539_v56, %v543_v57  ;;  %v1459_v52 = vcombine.high %v532_v46, %v536_v47  ;;  %v541_v56 = vld [vmem:[#allocation6 + $0xd8] sm:$0xff]  ;;  %p1667_p10 = pnand %p1666_p4, %p2082_p8 }
  0x5e   : > { %v1431_v33 = vcombine.high %v546_v31, %v550_v32  ;;  %v1430_v34 = vcombine.low %v546_v31, %v550_v32  ;;  %v554_v35 = vld [vmem:[#allocation6 + $0x140] sm:$0xff]  ;;  %v1447_v63 = vcombine.high %v547_v60, %v551_v61  ;;  %v555_v0 = vld [vmem:[#allocation6 + $0x148] sm:$0xff]  ;;  %v1446_v2 = vcombine.low %v547_v60, %v551_v61  ;;  %v545_v57 = vld [vmem:[#allocation6 + $0xf8] sm:$0xff]  ;;  %p1674_p5 = por %p1673_p3, %p1672_p2 }
  0x5f   : > { %673 = vmatpush1.bf16.msra.mxu0 %v1424_v22  ;;  %v558_v36 = vld [vmem:[#allocation6 + $0x160] sm:$0xff]  ;;  %v559_v1 = vld [vmem:[#allocation6 + $0x168] sm:$0xff]  ;;  %v520_v22 = vld [vmem:[#allocation6 + $0x30] sm:$0xff]  ;;  %v1477_v61 = vcombine.high %v541_v56, %v545_v57  ;;  %p1668_p11 = pneg %p1667_p10 }
  0x60   : > { %1513 = vmatpush3.bf16.msra.mxu1 %v1608_v10  ;;  %674 = vmatprep.subr.bf16.mxu0 %v1427_v25  ;;  %v1433_v37 = vcombine.high %v554_v35, %v558_v36  ;;  %v1432_v38 = vcombine.low %v554_v35, %v558_v36  ;;  %v1449_v3 = vcombine.high %v555_v0, %v559_v1  ;;  %v562_v5 = vld [vmem:[#allocation6 + $0x180] sm:$0xff]  ;;  %v563_v7 = vld [vmem:[#allocation6 + $0x188] sm:$0xff]  ;;  %v521_v25 = vld [vmem:[#allocation6 + $0x38] sm:$0xff] }
  0x61   : > { %848 = vmatprep.subr.bf16.mxu1 %v1439_v20  ;;  %v1448_v4 = vcombine.low %v555_v0, %v559_v1  ;;  %v566_v6 = vld [vmem:[#allocation6 + $0x1a0] sm:$0xff]  ;;  %v567_v9 = vld [vmem:[#allocation6 + $0x1a8] sm:$0xff]  ;;  %v1455_v24 = vcombine.high %v516_v21, %v520_v22  ;;  %v1470_v27 = vcombine.low %v517_v23, %v521_v25  ;;  %v1471_v28 = vcombine.high %v517_v23, %v521_v25  ;;  %v549_v0 = vld [vmem:[#allocation6 + $0x118] sm:$0xff]  ;;  %p1675_p6 = pnand %p1674_p5, %p1668_p11 }
  0x62   : > { %v1435_v8 = vcombine.high %v562_v5, %v566_v6  ;;  %v1434_v10 = vcombine.low %v562_v5, %v566_v6  ;;  %v1450_v11 = vcombine.low %v563_v7, %v567_v9  ;;  %v1451_v12 = vcombine.high %v563_v7, %v567_v9  ;;  %v570_v13 = vld [vmem:[#allocation6 + $0x1c0] sm:$0xff]  ;;  %v571_v15 = vld [vmem:[#allocation6 + $0x1c8] sm:$0xff]  ;;  %v553_v1 = vld [vmem:[#allocation6 + $0x138] sm:$0xff] }
  0x63   : > { %675 = vmatpush1.bf16.msra.mxu0 %v1426_v26  ;;  %v574_v14 = vld [vmem:[#allocation6 + $0x1e0] sm:$0xff]  ;;  %v575_v17 = vld [vmem:[#allocation6 + $0x1e8] sm:$0xff]  ;;  %v1454_v26 = vcombine.low %v516_v21, %v520_v22  ;;  %v1479_v5 = vcombine.high %v549_v0, %v553_v1  ;;  %v556_v6 = vld [vmem:[#allocation6 + $0x150] sm:$0xff] }
  0x64   : > { %676 = vmatprep.subr.bf16.mxu0 %v1429_v29  ;;  %v1437_v16 = vcombine.high %v570_v13, %v574_v14  ;;  %v1436_v18 = vcombine.low %v570_v13, %v574_v14  ;;  %v1453_v20 = vcombine.high %v571_v15, %v575_v17  ;;  %v1762_v29 = vmov 0   ;;  %v560_v7 = vld [vmem:[#allocation6 + $0x170] sm:$0xff]  ;;  %v561_v9 = vld [vmem:[#allocation6 + $0x178] sm:$0xff] }
  0x65   : > { %702 = vmatprep.mubr.bf16.mxu0 %v1762_v29  ;;  %v564_v14 = vld [vmem:[#allocation6 + $0x190] sm:$0xff]  ;;  %v577_v25 = vld [vmem:[#allocation6 + $0x1f8] sm:$0xff] }
  0x66   : > { %v572_v22 = vld [vmem:[#allocation6 + $0x1d0] sm:$0xff] }
  0x67   : > { %677 = vmatpush1.bf16.msra.mxu0 %v1428_v30  ;;  %v1416_v30 = vld [vmem:[%s2060_s4] ss:$0 sm:$0xff]  ;;  %v576_v23 = vld [vmem:[#allocation6 + $0x1f0] sm:$0xff] }
  0x68   : > { %678 = vmatprep.subr.bf16.mxu0 %v1431_v33 }
  0x6b   : > { %679 = vmatpush1.bf16.msra.mxu0 %v1430_v34 }
  0x6c   : > { %680 = vmatprep.subr.bf16.mxu0 %v1433_v37  ;;  %v524_v37 = vld [vmem:[#allocation6 + $0x50] sm:$0xff] }
  0x6f   : > { %681 = vmatpush1.bf16.msra.mxu0 %v1432_v38  ;;  %v528_v38 = vld [vmem:[#allocation6 + $0x70] sm:$0xff] }
  0x70   : > { %682 = vmatprep.subr.bf16.mxu0 %v1435_v8  ;;  %v557_v8 = vld [vmem:[#allocation6 + $0x158] sm:$0xff] }
  0x71   : > { %v1481_v13 = vcombine.high %v557_v8, %v561_v9 }
  0x73   : > { %683 = vmatpush1.bf16.msra.mxu0 %v1434_v10 }
  0x74   : > { %684 = vmatprep.subr.bf16.mxu0 %v1437_v16  ;;  %v565_v16 = vld [vmem:[#allocation6 + $0x198] sm:$0xff] }
  0x77   : > { %685 = vmatpush1.bf16.msra.mxu0 %v1436_v18  ;;  %v1464_v18 = vcombine.low %v556_v6, %v560_v7 }
  0x78   : > { %1022 = vmatprep.subr.bf16.mxu0 %v1455_v24  ;;  %v573_v24 = vld [vmem:[#allocation6 + $0x1d8] sm:$0xff] }
 0x12d   : > { %v417_v40 = vpop.f32.mrb[0].mxu0 }
 0x12e   : > { %v418_v41 = vadd.f32 %v1413_v39, %v417_v40  ;;  %v1504_v42 = vpop.f32.mrb[1].mxu0  ;;  %v529_v40 = vld [vmem:[#allocation6 + $0x78] sm:$0xff] }
 0x12f   : > { %v420_v43 = vpop.f32.mrb[2].mxu0 }
 0x130   : > { %v421_v44 = vadd.f32 %v1413_v39, %v420_v43  ;;  %v1505_v45 = vpop.f32.mrb[3].mxu0  ;;  %v424_v48 = vmax.f32 %v418_v41, 0.0  ;;  %v525_v39 = vld [vmem:[#allocation6 + $0x58] sm:$0xff] }
 0x131   : > { %v1473_v45 = vcombine.high %v525_v39, %v529_v40 }
 0x132   : > { %v425_v49 = vmax.f32 %v421_v44, 0.0  ;;  %v1457_v44 = vcombine.high %v524_v37, %v528_v38 }
 0x134   : > { %v426_v50 = vpack.c.bf16 %v425_v49, %v424_v48  ;;  %v533_v48 = vld [vmem:[#allocation6 + $0x98] sm:$0xff] }
 0x135   : > { %v537_v49 = vld [vmem:[#allocation6 + $0xb8] sm:$0xff] }
 0x136   : > { %1515 = vmatmul.mubr.msk.bf16.vlgmr.msra.gmra.mrb[0].mxu1 %vm466_vm4, %v426_v50  ;;  %v1456_v50 = vcombine.low %v524_v37, %v528_v38  ;;  %v1475_v53 = vcombine.high %v533_v48, %v537_v49  ;;  %v756_v37 = vld [vmem:[%s2062_s6 + $0x2] sm:$0x3] }
 0x137   : > { %849 = vmatpush1.bf16.msra.mxu1 %v1438_v19  ;;  %v1452_v19 = vcombine.low %v571_v15, %v575_v17  ;;  %880 = vmatprep.mubr.bf16.mxu1 %v1762_v29  ;;  %v568_v15 = vld [vmem:[#allocation6 + $0x1b0] sm:$0xff]  ;;  %v569_v17 = vld [vmem:[#allocation6 + $0x1b8] sm:$0xff] }
 0x138   : > { %850 = vmatprep.subr.bf16.mxu1 %v1441_v51  ;;  %v1472_v51 = vcombine.low %v525_v39, %v529_v40  ;;  %v1483_v21 = vcombine.high %v565_v16, %v569_v17 }
 0x13b   : > { %851 = vmatpush1.bf16.msra.mxu1 %v1440_v54  ;;  %v540_v54 = vld [vmem:[#allocation6 + $0xd0] sm:$0xff] }
 0x13c   : > { %852 = vmatprep.subr.bf16.mxu1 %v1443_v55  ;;  %v544_v55 = vld [vmem:[#allocation6 + $0xf0] sm:$0xff] }
 0x13d   : > { %v1461_v60 = vcombine.high %v540_v54, %v544_v55 }
 0x13f   : > { %853 = vmatpush1.bf16.msra.mxu1 %v1442_v58  ;;  %v1458_v58 = vcombine.low %v532_v46, %v536_v47 }
 0x140   : > { %854 = vmatprep.subr.bf16.mxu1 %v1445_v59  ;;  %v1474_v59 = vcombine.low %v533_v48, %v537_v49 }
 0x143   : > { %855 = vmatpush1.bf16.msra.mxu1 %v1444_v62  ;;  %v548_v62 = vld [vmem:[#allocation6 + $0x110] sm:$0xff] }
 0x144   : > { %856 = vmatprep.subr.bf16.mxu1 %v1447_v63  ;;  %v552_v63 = vld [vmem:[#allocation6 + $0x130] sm:$0xff] }
 0x145   : > { %v1462_v10 = vcombine.low %v548_v62, %v552_v63 }
 0x147   : > { %857 = vmatpush1.bf16.msra.mxu1 %v1446_v2  ;;  %v1460_v2 = vcombine.low %v540_v54, %v544_v55 }
 0x148   : > { %858 = vmatprep.subr.bf16.mxu1 %v1449_v3  ;;  %v1476_v3 = vcombine.low %v541_v56, %v545_v57 }
 0x14b   : > { %859 = vmatpush1.bf16.msra.mxu1 %v1448_v4  ;;  %v1463_v4 = vcombine.high %v548_v62, %v552_v63 }
 0x14c   : > { %860 = vmatprep.subr.bf16.mxu1 %v1451_v12  ;;  %v1465_v12 = vcombine.high %v556_v6, %v560_v7 }
 0x14f   : > { %861 = vmatpush1.bf16.msra.mxu1 %v1450_v11  ;;  %v1478_v11 = vcombine.low %v549_v0, %v553_v1 }
 0x150   : > { %862 = vmatprep.subr.bf16.mxu1 %v1453_v20  ;;  %v1467_v20 = vcombine.high %v564_v14, %v568_v15 }
 0x153   : > { %863 = vmatpush1.bf16.msra.mxu1 %v1452_v19  ;;  %v1480_v19 = vcombine.low %v557_v8, %v561_v9 }
 0x154   : > { %1196 = vmatprep.subr.bf16.mxu1 %v1471_v28  ;;  %v1469_v28 = vcombine.high %v572_v22, %v576_v23 }
 0x209   : > { %v504_v31 = vpop.f32.mrb[0].mxu1 }
 0x20a   : > { %v505_v32 = vadd.f32 %v1416_v30, %v504_v31  ;;  %v1516_v33 = vpop.f32.mrb[1].mxu1  ;;  %v1484_v31 = vcombine.low %v573_v24, %v577_v25 }
 0x20b   : > { %v507_v34 = vpop.f32.mrb[2].mxu1  ;;  %v580_v33 = vlaneseq }
 0x20c   : > { %v508_v35 = vadd.f32 %v1416_v30, %v507_v34  ;;  %v1517_v36 = vpop.f32.mrb[3].mxu1  ;;  %v511_v41 = vmax.f32 %v505_v32, 0.0  ;;  %v1468_v30 = vcombine.low %v572_v22, %v576_v23  ;;  %v1763_v32 = vmov -inf  }
 0x20d   : > { %356 = vst [vmem:[#allocation2] sm:$0xff] %v1763_v32  ;;  %v581_v34 = vshrl.u32 %v580_v33, 7  ;;  %v578_v36 = vld [vmem:[%s2062_s6] sm:$0x3]  ;;  %vm1984_vm5 = vcmp.lt.s32.totalorder %v580_v33, 256 }
 0x20e   : > { %v512_v42 = vmax.f32 %v508_v35, 0.0 }
 0x20f   : > { %v1957_v35 = vsub.s32 0, %v581_v34  ;;  %v1965_v38 = vsub.s32 1, %v581_v34 }
 0x210   : > { %v1950_v43 = vpack.c.bf16 %v512_v42, %v511_v41 }
 0x211   : > { %v583_v39 = vrot.slane %v578_v36, %v1957_v35  ;;  %v761_v40 = vrot.slane %v756_v37, %v1957_v35  ;;  %v587_v41 = vrot.slane %v578_v36, %v1965_v38  ;;  %v765_v42 = vrot.slane %v756_v37, %v1965_v38 }
 0x212   : > { %703 = vmatmul.mubr.bf16.vlgmr.msra.gmra.mrb[4].mxu0 %v1950_v43  ;;  %881 = vmatmul.mubr.bf16.vlgmr.msra.gmra.mrb[4].mxu1 %v1950_v43 }
 0x213   : > { %1023 = vmatpush1.bf16.msra.mxu0 %v1454_v26  ;;  %1197 = vmatpush1.bf16.msra.mxu1 %v1470_v27  ;;  %v1466_v26 = vcombine.low %v564_v14, %v568_v15  ;;  %v1482_v27 = vcombine.low %v565_v16, %v569_v17 }
 0x214   : > { %1024 = vmatprep.subr.bf16.mxu0 %v1457_v44  ;;  %1198 = vmatprep.subr.bf16.mxu1 %v1473_v45 }
 0x215   : > { %1054 = vmatprep.mubr.bf16.mxu0 %v1762_v29  ;;  %1228 = vmatprep.mubr.bf16.mxu1 %v1762_v29  ;;  %v1485_v29 = vcombine.high %v573_v24, %v577_v25 }
 0x217   : > { %1025 = vmatpush1.bf16.msra.mxu0 %v1456_v50  ;;  %1199 = vmatpush1.bf16.msra.mxu1 %v1472_v51 }
 0x218   : > { %1026 = vmatprep.subr.bf16.mxu0 %v1459_v52  ;;  %1200 = vmatprep.subr.bf16.mxu1 %v1475_v53 }
 0x21b   : > { %1027 = vmatpush1.bf16.msra.mxu0 %v1458_v58  ;;  %1201 = vmatpush1.bf16.msra.mxu1 %v1474_v59 }
 0x21c   : > { %1028 = vmatprep.subr.bf16.mxu0 %v1461_v60  ;;  %1202 = vmatprep.subr.bf16.mxu1 %v1477_v61 }
 0x21f   : > { %1029 = vmatpush1.bf16.msra.mxu0 %v1460_v2  ;;  %1203 = vmatpush1.bf16.msra.mxu1 %v1476_v3 }
 0x220   : > { %1030 = vmatprep.subr.bf16.mxu0 %v1463_v4  ;;  %1204 = vmatprep.subr.bf16.mxu1 %v1479_v5 }
 0x223   : > { %1031 = vmatpush1.bf16.msra.mxu0 %v1462_v10  ;;  %1205 = vmatpush1.bf16.msra.mxu1 %v1478_v11 }
 0x224   : > { %1032 = vmatprep.subr.bf16.mxu0 %v1465_v12  ;;  %1206 = vmatprep.subr.bf16.mxu1 %v1481_v13  ;;  %v1764_v13 = vmov 1966171168  }
 0x225   : > { %v736_v14 = vunpack.c.l.s4 %v1764_v13 }
 0x227   : > { %1033 = vmatpush1.bf16.msra.mxu0 %v1464_v18  ;;  %1207 = vmatpush1.bf16.msra.mxu1 %v1480_v19  ;;  %v737_v23 = vunpack.c.0.s8 %v736_v14 }
 0x228   : > { %1034 = vmatprep.subr.bf16.mxu0 %v1467_v20  ;;  %1208 = vmatprep.subr.bf16.mxu1 %v1483_v21 }
 0x229   : > { %v1971_v32 = vsub.s32 %v737_v23, %v581_v34  ;;  %v1104_v34 = vld [vmem:[%s2062_s6 + $0x6] sm:$0x3] }
 0x22b   : > { %1035 = vmatpush1.bf16.msra.mxu0 %v1466_v26  ;;  %1209 = vmatpush1.bf16.msra.mxu1 %v1482_v27 }
 0x22c   : > { %1036 = vmatprep.subr.bf16.mxu0 %v1469_v28  ;;  %1210 = vmatprep.subr.bf16.mxu1 %v1485_v29 }
 0x22f   : > { %1037 = vmatpush1.bf16.msra.mxu0 %v1468_v30  ;;  %1211 = vmatpush1.bf16.msra.mxu1 %v1484_v31 }
 0x232   : > { %1055 = vmatmul.mubr.bf16.vlgmr.msra.gmra.mrb[8].mxu0 %v1950_v43  ;;  %1229 = vmatmul.mubr.bf16.vlgmr.msra.gmra.mrb[8].mxu1 %v1950_v43 }
 0x2e5   : > { %v704_v43 = vpop.f32.mrb[4].mxu0  ;;  %v882_v44 = vpop.f32.mrb[4].mxu1 }
 0x2e6   : > { %v705_v45 = vadd.f32 %v704_v43, %v583_v39  ;;  %v883_v46 = vadd.f32 %v882_v44, %v761_v40  ;;  %v706_v47 = vpop.f32.mrb[5].mxu0  ;;  %v884_v48 = vpop.f32.mrb[5].mxu1  ;;  %v731_v43 = vld [vmem:[#allocation2] sm:$0x3]  ;;  %v909_v44 = vld [vmem:[#allocation2 + $0x2] sm:$0x3] }
 0x2e7   : > { %v707_v49 = vadd.f32 %v706_v47, %v587_v41  ;;  %v885_v50 = vadd.f32 %v884_v48, %v765_v42  ;;  %v708_v51 = vpop.f32.mrb[6].mxu0  ;;  %v886_v52 = vpop.f32.mrb[6].mxu1  ;;  %v930_v47 = vld [vmem:[%s2062_s6 + $0x4] sm:$0x3] }
 0x2e8   : > { %v709_v53 = vadd.f32 %v708_v51, %v583_v39  ;;  %v887_v54 = vadd.f32 %v886_v52, %v761_v40  ;;  %v710_v55 = vpop.f32.mrb[7].mxu0  ;;  %v888_v56 = vpop.f32.mrb[7].mxu1  ;;  %v713_v59 = vmax.f32 %v705_v45, 0.0  ;;  %v891_v60 = vmax.f32 %v883_v46, 0.0 }
 0x2e9   : > { %v711_v57 = vadd.f32 %v710_v55, %v587_v41  ;;  %v889_v58 = vadd.f32 %v888_v56, %v765_v42  ;;  %v714_v63 = vmax.f32 %v707_v49, 0.0  ;;  %v892_v0 = vmax.f32 %v885_v50, 0.0 }
 0x2ea   : > { %v715_v61 = vmax.f32 %v709_v53, 0.0  ;;  %v893_v62 = vmax.f32 %v887_v54, 0.0  ;;  %v935_v51 = vrot.slane %v930_v47, %v1957_v35  ;;  %v1109_v52 = vrot.slane %v1104_v34, %v1957_v35 }
 0x2eb   : > { %v716_v1 = vmax.f32 %v711_v57, 0.0  ;;  %v894_v2 = vmax.f32 %v889_v58, 0.0  ;;  %v939_v53 = vrot.slane %v930_v47, %v1965_v38  ;;  %v1113_v54 = vrot.slane %v1104_v34, %v1965_v38 }
 0x2ec   : > { %v717_v3 = vmax.f32 %v713_v59, %v715_v61  ;;  %v895_v4 = vmax.f32 %v891_v60, %v893_v62 }
 0x2ed   : > { %v724_v5 = vmax.f32 %v714_v63, %v716_v1  ;;  %v902_v6 = vmax.f32 %v892_v0, %v894_v2 }
 0x2ee   : > { %v718_v7 = vrot.slane %v717_v3, 4  ;;  %v896_v8 = vrot.slane %v895_v4, 4 }
 0x2ef   : > { %v725_v9 = vrot.slane %v724_v5, 4  ;;  %v903_v10 = vrot.slane %v902_v6, 4 }
 0x2f0   : > { %v719_v11 = vmax.f32 %v717_v3, %v718_v7  ;;  %v897_v12 = vmax.f32 %v895_v4, %v896_v8 }
 0x2f1   : > { %v726_v15 = vmax.f32 %v724_v5, %v725_v9  ;;  %v904_v16 = vmax.f32 %v902_v6, %v903_v10 }
 0x2f2   : > { %v720_v17 = vrot.slane %v719_v11, 2  ;;  %v898_v18 = vrot.slane %v897_v12, 2 }
 0x2f3   : > { %v727_v19 = vrot.slane %v726_v15, 2  ;;  %v905_v20 = vrot.slane %v904_v16, 2 }
 0x2f4   : > { %v721_v21 = vmax.f32 %v719_v11, %v720_v17  ;;  %v899_v22 = vmax.f32 %v897_v12, %v898_v18 }
 0x2f5   : > { %v728_v24 = vmax.f32 %v726_v15, %v727_v19  ;;  %v906_v25 = vmax.f32 %v904_v16, %v905_v20 }
 0x2f6   : > { %v722_v26 = vrot.slane %v721_v21, 1  ;;  %v900_v27 = vrot.slane %v899_v22, 1 }
 0x2f7   : > { %v729_v28 = vrot.slane %v728_v24, 1  ;;  %v907_v29 = vrot.slane %v906_v25, 1 }
 0x2f8   : > { %v723_v30 = vmax.f32 %v721_v21, %v722_v26  ;;  %v901_v31 = vmax.f32 %v899_v22, %v900_v27 }
 0x2f9   : > { %v730_v36 = vmax.f32 %v728_v24, %v729_v28  ;;  %v908_v37 = vmax.f32 %v906_v25, %v907_v29 }
 0x2fb   : > { %v734_v39 = vcombine.low %v723_v30, %v730_v36  ;;  %v912_v40 = vcombine.low %v901_v31, %v908_v37 }
 0x2fd   : > { %v741_v41 = vrot.slane %v734_v39, %v1971_v32  ;;  %v919_v42 = vrot.slane %v912_v40, %v1971_v32 }
 0x2ff   : > { %v748_v45 = vrot.slane %v741_v41, %v1971_v32  ;;  %v926_v46 = vrot.slane %v919_v42, %v1971_v32 }
 0x301   : > { %v750_v49 = vmax.f32 %v731_v43, %v748_v45  ;;  %v928_v50 = vmax.f32 %v909_v44, %v926_v46 }
 0x303   : > { %755 = vst.msk [vmem:[#allocation2] sm:$0x3] %vm1984_vm5, %v750_v49  ;;  %929 = vst.msk [vmem:[#allocation2 + $0x2] sm:$0x3] %vm1984_vm5, %v928_v50  ;;  %v1083_v49 = vld [vmem:[#allocation2 + $0x4] sm:$0x3] }
 0x304   : > { %v1257_v50 = vld [vmem:[#allocation2 + $0x6] sm:$0x3] }
 0x305   : > { %v1056_v33 = vpop.f32.mrb[8].mxu0  ;;  %v1230_v55 = vpop.f32.mrb[8].mxu1 }
 0x306   : > { %v1057_v56 = vadd.f32 %v1056_v33, %v935_v51  ;;  %v1231_v57 = vadd.f32 %v1230_v55, %v1109_v52  ;;  %v1058_v58 = vpop.f32.mrb[9].mxu0  ;;  %v1232_v59 = vpop.f32.mrb[9].mxu1 }
 0x307   : > { %v1059_v60 = vadd.f32 %v1058_v58, %v939_v53  ;;  %v1233_v61 = vadd.f32 %v1232_v59, %v1113_v54  ;;  %v1060_v62 = vpop.f32.mrb[10].mxu0  ;;  %v1234_v35 = vpop.f32.mrb[10].mxu1 }
 0x308   : > { %v1061_v63 = vadd.f32 %v1060_v62, %v935_v51  ;;  %v1235_v0 = vadd.f32 %v1234_v35, %v1109_v52  ;;  %v1062_v1 = vpop.f32.mrb[11].mxu0  ;;  %v1236_v2 = vpop.f32.mrb[11].mxu1  ;;  %v1065_v5 = vmax.f32 %v1057_v56, 0.0  ;;  %v1239_v6 = vmax.f32 %v1231_v57, 0.0 }
 0x309   : > { %v1063_v3 = vadd.f32 %v1062_v1, %v939_v53  ;;  %v1237_v4 = vadd.f32 %v1236_v2, %v1113_v54  ;;  %v1066_v8 = vmax.f32 %v1059_v60, 0.0  ;;  %v1240_v9 = vmax.f32 %v1233_v61, 0.0 }
 0x30a   : > { %v1067_v7 = vmax.f32 %v1061_v63, 0.0  ;;  %v1241_v38 = vmax.f32 %v1235_v0, 0.0 }
 0x30b   : > { %v1068_v10 = vmax.f32 %v1063_v3, 0.0  ;;  %v1242_v11 = vmax.f32 %v1237_v4, 0.0 }
 0x30c   : > { %v1069_v12 = vmax.f32 %v1065_v5, %v1067_v7  ;;  %v1243_v13 = vmax.f32 %v1239_v6, %v1241_v38 }
 0x30d   : > { %v1076_v14 = vmax.f32 %v1066_v8, %v1068_v10  ;;  %v1250_v15 = vmax.f32 %v1240_v9, %v1242_v11 }
 0x30e   : > { %v1070_v16 = vrot.slane %v1069_v12, 4  ;;  %v1244_v17 = vrot.slane %v1243_v13, 4 }
 0x30f   : > { %v1077_v18 = vrot.slane %v1076_v14, 4  ;;  %v1251_v19 = vrot.slane %v1250_v15, 4 }
 0x310   : > { %v1071_v20 = vmax.f32 %v1069_v12, %v1070_v16  ;;  %v1245_v21 = vmax.f32 %v1243_v13, %v1244_v17 }
 0x311   : > { %v1078_v22 = vmax.f32 %v1076_v14, %v1077_v18  ;;  %v1252_v23 = vmax.f32 %v1250_v15, %v1251_v19 }
 0x312   : > { %v1072_v24 = vrot.slane %v1071_v20, 2  ;;  %v1246_v25 = vrot.slane %v1245_v21, 2 }
 0x313   : > { %v1079_v26 = vrot.slane %v1078_v22, 2  ;;  %v1253_v27 = vrot.slane %v1252_v23, 2 }
 0x314   : > { %v1073_v28 = vmax.f32 %v1071_v20, %v1072_v24  ;;  %v1247_v29 = vmax.f32 %v1245_v21, %v1246_v25 }
 0x315   : > { %v1080_v30 = vmax.f32 %v1078_v22, %v1079_v26  ;;  %v1254_v31 = vmax.f32 %v1252_v23, %v1253_v27 }
 0x316   : > { %v1074_v36 = vrot.slane %v1073_v28, 1  ;;  %v1248_v37 = vrot.slane %v1247_v29, 1 }
 0x317   : > { %v1081_v39 = vrot.slane %v1080_v30, 1  ;;  %v1255_v40 = vrot.slane %v1254_v31, 1 }
 0x318   : > { %v1075_v41 = vmax.f32 %v1073_v28, %v1074_v36  ;;  %v1249_v42 = vmax.f32 %v1247_v29, %v1248_v37 }
 0x319   : > { %v1082_v43 = vmax.f32 %v1080_v30, %v1081_v39  ;;  %v1256_v44 = vmax.f32 %v1254_v31, %v1255_v40 }
 0x31b   : > { %v1086_v45 = vcombine.low %v1075_v41, %v1082_v43  ;;  %v1260_v46 = vcombine.low %v1249_v42, %v1256_v44 }
 0x31d   : > { %v1093_v47 = vrot.slane %v1086_v45, %v1971_v32  ;;  %v1267_v34 = vrot.slane %v1260_v46, %v1971_v32 }
 0x31f   : > { %v1100_v51 = vrot.slane %v1093_v47, %v1971_v32  ;;  %v1274_v52 = vrot.slane %v1267_v34, %v1971_v32 }
 0x321   : > { %v1102_v53 = vmax.f32 %v1083_v49, %v1100_v51  ;;  %v1276_v54 = vmax.f32 %v1257_v50, %v1274_v52 }
 0x323   : > { %1103 = vst.msk [vmem:[#allocation2 + $0x4] sm:$0x3] %vm1984_vm5, %v1102_v53  ;;  %1277 = vst.msk [vmem:[#allocation2 + $0x6] sm:$0x3] %vm1984_vm5, %v1276_v54 }
 0x32a   : > { %v1281_v32 = vld [vmem:[#allocation2] sm:$0xff] }
 0x32b   : > { %1282 = vst [vmem:[%s338_s8] sm:$0xff] %v1281_v32 }
 0x32c   : > { %1678 = shalt.err (!%p1675_p6)
}
 0x32d   : > { %s1679_s22 = scalar_lea.hbm %s2009_s20, 128  ;;  %s1683_s21 = scalar_lea.hbm %s2063_s7, 256 }
 0x32e   : > { %p1680_p7 = scmp.ne.s32.totalorder %s2009_s20, %s1679_s22  ;;  %p1684_p0 = scmp.lt.u32.totalorder %s2009_s20, %s2063_s7 }
 0x32f   : > { %p1685_p1 = scmp.lt.u32.totalorder %s1683_s21, %s1679_s22  ;;  %p1687_p4 = scmp.lt.u32.totalorder %s1679_s22, %s2009_s20 }
 0x330   : > { %p1681_p9 = pnand %p1680_p7, %p2082_p8 }
 0x331   : > { %p1686_p13 = por %p1685_p1, %p1684_p0 }
 0x332   : > { %p1682_p12 = pneg %p1681_p9 }
 0x333   : > { %p1688_p10 = por %p1687_p4, %p1686_p13 }
 0x335   : > { %p1689_p11 = pnand %p1688_p10, %p1682_p12 }
 0x337   : > { %1692 = shalt.err (!%p1689_p11)
}
 0x338   : > { %1526 = dma.vmem_to_hbm [thread:$0]  (%p2082_p8), %s2011_s10, 128, %s2009_s20, %s1284_s18  }
 0x339 PF: > { %p1543_p2 = scmp.ge.s32.totalorder %s1751_s29, 2  ;;  %s1312_s30 = sand.u32 1, %s1731_s24  }
 0x33a   : > { %p2083_p3 = scmp.ne.s32.totalorder %s2073_s13, 0  ;;  %s1313_s8 = scalar_lea.sflag [#allocation5], %s1312_s30 }
 0x33c   : > { %p1536_p5 = pnand %p1543_p2, %p2083_p3 }
 0x33e   : > { %1726 = dma.done.wait (!%p1536_p5), %s1313_s8, 128  }
 0x33f   : > { %1728 = vsyncadd (!%p1536_p5), %s1313_s8, 4294967168  ;;  %s22_s29 = sadd.s32 1, %s1751_s29   ;;  %s2084_s11 = sld [smem:[#allocation14_spill]] }
 0x340   : > { %p19_p6 = scmp.ge.s32.totalorder %s22_s29, 4   ;;  %s2085_s27 = sld [smem:[#allocation12_spill]] }
 0x341   : > { %s2086_s28 = sld [smem:[#allocation13_spill]]  ;;  %s2087_s24 = smov %s1735_s25 }
 0x342   : > { %s2088_s25 = smov %s1739_s26  ;;  %21 = sbr.rel (!%p19_p6) target bundleno = 6 (0x6), region = 100 }
 0x345   : > { %s2089_s26 = smov %s2084_s11 }
 0x349   :  { %1318 = vsyncpa [#allocation4], 1 }
 0x34a   :  { %1320 = vsyncpa [#allocation4 + $0x1], 1 }
 0x34b   :  { %1321 = vsyncpa [#allocation7], 1 }
 0x34c   :  { %1322 = vsyncpa [#allocation5], 1 }
 0x34d   :  { %1324 = vsyncpa [#allocation5 + $0x1], 1 }

</bundles_post_ra>
